<compile_context>
chip_gen: v6e
topology: v6e:2x2x1
jax: 0.10.0
libtpu: 0.0.40
codegen_flags: <defaults>
</compile_context>

<pallas_src>
import jax
import jax.numpy as jnp
from jax.experimental import pallas as pl
from jax.experimental.pallas import tpu as pltpu

IN_DIM = 100
HID_DIM = 100
OUT_DIM = 10
MAX_TILE_B = 4096   # 4096x100 f32 x-tile ~1.6 MiB; double-buffered x + out
                    # buffers stay far below v7x's 32 MiB scoped VMEM.


def _round_up(n, m):
    return (n + m - 1) // m * m


def _mlp_kernel(x_ref, w1_ref, b1_ref, w2_ref, b2_ref, o_ref):
    # Fused hot path:  out = (relu(x @ W1 + b1) + x) @ W2 + b2
    x = x_ref[...]                                                    # (tb, 100) f32
    h = jnp.dot(x, w1_ref[...], preferred_element_type=jnp.float32)  # MXU
    h = jnp.maximum(h + b1_ref[...], 0.0) + x                        # ReLU + residual (VPU)
    out = jnp.dot(h, w2_ref[...], preferred_element_type=jnp.float32) + b2_ref[...]
    o_ref[...] = out.astype(o_ref.dtype)                             # (tb, 10)


def simple_module_forward(x, w1, b1, w2, b2):
    """Forward pass of SimpleModule.

    x : (B, 100) f32
    w1: (100, 100) stored (in, out)    b1: (100,)
    w2: (100, 10)  stored (in, out)    b2: (10,)
    returns (B, 10) f32
    """
    B = x.shape[0]
    # Large sublane-aligned batch tile; cap so the grid has >= 2 steps when
    # B is big enough (keeps both v7x TensorCores busy). For tiny B this
    # degenerates to a single small aligned tile.
    tile_b = min(MAX_TILE_B, max(8, _round_up(pl.cdiv(B, 2), 8)))
    grid = (pl.cdiv(B, tile_b),)   # ragged tail OK: per-row compute, OOB writes dropped

    # Biases as (1, N) rows so they are 2-D VMEM tiles that broadcast cleanly.
    b1_2d = b1.reshape(1, HID_DIM)
    b2_2d = b2.reshape(1, OUT_DIM)

    cost = pl.CostEstimate(
        flops=B * (2 * IN_DIM * HID_DIM + 2 * HID_DIM * OUT_DIM),
        transcendentals=0,
        bytes_accessed=4 * (B * IN_DIM + B * OUT_DIM
                            + IN_DIM * HID_DIM + HID_DIM * OUT_DIM
                            + HID_DIM + OUT_DIM),
    )

    return pl.pallas_call(
        _mlp_kernel,
        out_shape=jax.ShapeDtypeStruct((B, OUT_DIM), x.dtype),
        grid_spec=pltpu.PrefetchScalarGridSpec(
            num_scalar_prefetch=0,
            grid=grid,
            in_specs=[
                # x: pipelined batch tiles; last dim 100 == full array dim (legal).
                pl.BlockSpec((tile_b, IN_DIM), lambda i: (i, 0)),
                # Weights / biases: constant index_map -> resident in VMEM.
                pl.BlockSpec((IN_DIM, HID_DIM), lambda i: (0, 0)),
                pl.BlockSpec((1, HID_DIM), lambda i: (0, 0)),
                pl.BlockSpec((HID_DIM, OUT_DIM), lambda i: (0, 0)),
                pl.BlockSpec((1, OUT_DIM), lambda i: (0, 0)),
            ],
            # Output written directly at its true 10-wide shape (no pad/slice).
            out_specs=pl.BlockSpec((tile_b, OUT_DIM), lambda i: (i, 0)),
        ),
        compiler_params=pltpu.CompilerParams(
            # Batch tiles are independent -> shard across TensorCores (v7x megacore).
            dimension_semantics=("parallel",),
        ),
        cost_estimate=cost,
    )(x, w1, b1_2d, w2, b2_2d)


def _init_params(key):
    """Deterministic param init mirroring torch.nn.Linear.

    PyTorch Linear(in, out) stores weight (out, in), bias (out,).
    We keep weights transposed, i.e. (in, out), and biases as (out,).
    """
    k1, k2, k3, k4 = jax.random.split(key, 4)
    bound1 = 1.0 / (IN_DIM ** 0.5)
    w1 = jax.random.uniform(k1, (IN_DIM, HID_DIM), jnp.float32, -bound1, bound1)
    b1 = jax.random.uniform(k2, (HID_DIM,), jnp.float32, -bound1, bound1)
    bound2 = 1.0 / (HID_DIM ** 0.5)
    w2 = jax.random.uniform(k3, (HID_DIM, OUT_DIM), jnp.float32, -bound2, bound2)
    b2 = jax.random.uniform(k4, (OUT_DIM,), jnp.float32, -bound2, bound2)
    return w1, b1, w2, b2


def _reference(x, w1, b1, w2, b2):
    h = jnp.maximum(x @ w1 + b1, 0.0) + x
    return h @ w2 + b2


if __name__ == "__main__":
    key = jax.random.PRNGKey(0)
    k_params, k_x = jax.random.split(key)
    w1, b1, w2, b2 = _init_params(k_params)

    # Small batch that still exercises a multi-step grid with a ragged tail
    # (tile_b becomes 16 -> grid of 2 blocks over 24 rows).
    B = 24
    x = jax.random.normal(k_x, (B, IN_DIM), jnp.float32)

    out = simple_module_forward(x, w1, b1, w2, b2)
    out = jax.block_until_ready(out)

    ref = _reference(x, w1, b1, w2, b2)
    assert out.shape == (B, OUT_DIM), out.shape
    assert jnp.allclose(out, ref, atol=1e-4, rtol=1e-4), "mismatch vs reference"

    print("KERNEL_OK")
</pallas_src>

<mosaic_0001>
module attributes {stable_mosaic.version = 11 : i64} {
  func.func @_mlp_kernel(%arg0: i32, %arg1: memref<16x100xf32, #tpu.memory_space<vmem>>, %arg2: memref<100x100xf32, #tpu.memory_space<vmem>>, %arg3: memref<1x100xf32, #tpu.memory_space<vmem>>, %arg4: memref<100x10xf32, #tpu.memory_space<vmem>>, %arg5: memref<1x10xf32, #tpu.memory_space<vmem>>, %arg6: memref<16x10xf32, #tpu.memory_space<vmem>>) attributes {dimension_semantics = [#tpu.dimension_semantics<parallel>], iteration_bounds = array<i64: 2>, scalar_prefetch = 0 : i64, scratch_operands = 0 : i64, tpu.core_type = #tpu.core_type<tc>, window_params = [{transform_indices = @transform_0, window_bounds = array<i64: 16, 100>}, {pipeline_mode = #tpu.pipeline_mode<synchronous>, transform_indices = @transform_1, window_bounds = array<i64: 100, 100>}, {pipeline_mode = #tpu.pipeline_mode<synchronous>, transform_indices = @transform_2, window_bounds = array<i64: 1, 100>}, {pipeline_mode = #tpu.pipeline_mode<synchronous>, transform_indices = @transform_3, window_bounds = array<i64: 100, 10>}, {pipeline_mode = #tpu.pipeline_mode<synchronous>, transform_indices = @transform_4, window_bounds = array<i64: 1, 10>}, {transform_indices = @transform_5, window_bounds = array<i64: 16, 10>}]} {
    %c0 = arith.constant 0 : index
    %c0_0 = arith.constant 0 : index
    %0 = vector.load %arg1[%c0, %c0_0] : memref<16x100xf32, #tpu.memory_space<vmem>>, vector<16x100xf32>
    %c0_1 = arith.constant 0 : index
    %c0_2 = arith.constant 0 : index
    %1 = vector.load %arg2[%c0_1, %c0_2] : memref<100x100xf32, #tpu.memory_space<vmem>>, vector<100x100xf32>
    %cst = arith.constant dense<0.000000e+00> : vector<16x100xf32>
    %2 = tpu.matmul %0, %1, %cst {dimension_numbers = #tpu.dot_dimension_numbers<[1], [0], [0], [1], [0, 0, 1, 1], [], []>} : vector<16x100xf32>, vector<100x100xf32>, vector<16x100xf32> -> vector<16x100xf32>
    %c0_3 = arith.constant 0 : index
    %c0_4 = arith.constant 0 : index
    %3 = vector.load %arg3[%c0_3, %c0_4] : memref<1x100xf32, #tpu.memory_space<vmem>>, vector<1x100xf32>
    %4 = vector.broadcast %3 : vector<1x100xf32> to vector<16x100xf32>
    %5 = arith.addf %2, %4 : vector<16x100xf32>
    %cst_5 = arith.constant 0.000000e+00 : f32
    %6 = vector.broadcast %cst_5 : f32 to vector<16x100xf32>
    %7 = arith.maximumf %5, %6 : vector<16x100xf32>
    %8 = arith.addf %7, %0 : vector<16x100xf32>
    %c0_6 = arith.constant 0 : index
    %c0_7 = arith.constant 0 : index
    %9 = vector.load %arg4[%c0_6, %c0_7] : memref<100x10xf32, #tpu.memory_space<vmem>>, vector<100x10xf32>
    %cst_8 = arith.constant dense<0.000000e+00> : vector<16x10xf32>
    %10 = tpu.matmul %8, %9, %cst_8 {dimension_numbers = #tpu.dot_dimension_numbers<[1], [0], [0], [1], [0, 0, 1, 1], [], []>} : vector<16x100xf32>, vector<100x10xf32>, vector<16x10xf32> -> vector<16x10xf32>
    %c0_9 = arith.constant 0 : index
    %c0_10 = arith.constant 0 : index
    %11 = vector.load %arg5[%c0_9, %c0_10] : memref<1x10xf32, #tpu.memory_space<vmem>>, vector<1x10xf32>
    %12 = vector.broadcast %11 : vector<1x10xf32> to vector<16x10xf32>
    %13 = arith.addf %10, %12 : vector<16x10xf32>
    %c0_11 = arith.constant 0 : index
    %c0_12 = arith.constant 0 : index
    %14 = vector.load %arg6[%c0_11, %c0_12] : memref<16x10xf32, #tpu.memory_space<vmem>>, vector<16x10xf32>
    tpu.vector_store %arg6[%c0_11, %c0_12], %13 {strides = array<i32>} : memref<16x10xf32, #tpu.memory_space<vmem>>, vector<16x10xf32>,
    return
  }
  func.func @transform_0(%arg0: i32) -> (i32, i32) {
    %c0_i32 = arith.constant 0 : i32
    %c0_i32_0 = arith.constant 0 : i32
    return %arg0, %c0_i32 : i32, i32
  }
  func.func @transform_1(%arg0: i32) -> (i32, i32) {
    %c0_i32 = arith.constant 0 : i32
    %c0_i32_0 = arith.constant 0 : i32
    %c0_i32_1 = arith.constant 0 : i32
    return %c0_i32, %c0_i32_0 : i32, i32
  }
  func.func @transform_2(%arg0: i32) -> (i32, i32) {
    %c0_i32 = arith.constant 0 : i32
    %c0_i32_0 = arith.constant 0 : i32
    %c0_i32_1 = arith.constant 0 : i32
    return %c0_i32, %c0_i32_0 : i32, i32
  }
  func.func @transform_3(%arg0: i32) -> (i32, i32) {
    %c0_i32 = arith.constant 0 : i32
    %c0_i32_0 = arith.constant 0 : i32
    %c0_i32_1 = arith.constant 0 : i32
    return %c0_i32, %c0_i32_0 : i32, i32
  }
  func.func @transform_4(%arg0: i32) -> (i32, i32) {
    %c0_i32 = arith.constant 0 : i32
    %c0_i32_0 = arith.constant 0 : i32
    %c0_i32_1 = arith.constant 0 : i32
    return %c0_i32, %c0_i32_0 : i32, i32
  }
  func.func @transform_5(%arg0: i32) -> (i32, i32) {
    %c0_i32 = arith.constant 0 : i32
    %c0_i32_0 = arith.constant 0 : i32
    return %arg0, %c0_i32 : i32, i32
  }
}

</mosaic_0001>

<bundles_post_ra>
// kernel: tpu_custom_call.1
= control target key start
LH: loop header
LB: loop body
LE: loop exit
PB: predicated region body
PF: predicated region fallthrough
CT: control target
= control target key end

     0   :  { %10 = vsyncpa [#allocation3], 0  ;;  %s1338_s0 = inlined_call_operand.hbm [shape: f32[24,100], index: 0, kind: input, shape index: {}]   ;;  %s1339_s1 = inlined_call_operand.vmem [shape: f32[100,100], index: 1, kind: input, shape index: {}]   ;;  %s1340_s2 = inlined_call_operand.vmem [shape: f32[1,100], index: 2, kind: input, shape index: {}]   ;;  %s1341_s3 = inlined_call_operand.vmem [shape: f32[100,10], index: 3, kind: input, shape index: {}]   ;;  %s1342_s4 = inlined_call_operand.vmem [shape: f32[1,10], index: 4, kind: input, shape index: {}]   ;;  %s1343_s5 = inlined_call_operand.vmem [shape: f32[24,10], index: 5, kind: output, shape index: {}]  }
   0x1   :  { %12 = vsyncpa [#allocation3 + $0x1], 0  ;;  %s1093_s18 = smov 0   ;;  %s1095_s19 = smov 0  }
   0x2   :  { %s1097_s20 = smov 0   ;;  %s1099_s21 = smov 0  }
   0x3 LB: > { %s1112_s22 = sadd.s32 4294967295, %s1026_s21   ;;  %s1115_s23 = sadd.s32 1, %s1026_s21   ;;  %s1026_s21 = sphi %s1099_s21, %s1349_s21   ;;  %s1022_s20 = sphi %s1097_s20, %s1348_s20   ;;  %s1018_s19 = sphi %s1095_s19, %s1347_s19   ;;  %s1014_s18 = sphi %s1093_s18, %s1346_s18  }
   0x4   : > { %s22_s24 = ssub.s32 %s1026_s21, %s1115_s23  ;;  %s25_s25 = sadd.s32 1, %s1022_s20 }
   0x5   : > { %p23_p0 = scmp.eq.s32.totalorder %s22_s24, 0  ;;  %p32_p1 = scmp.ne.s32.totalorder %s1022_s20, %s1018_s19 }
   0x6   : > { %p33_p2 = scmp.eq.s32.totalorder %s1026_s21, 0  ;;  %p38_p3 = scmp.ne.s32.totalorder %s1018_s19, %s1014_s18 }
   0x7   : > { %s1125_s26 = scalar_select %p23_p0, %s1022_s20, %s25_s25  }
   0x8   : > { %p34_p4 = por %p33_p2, %p32_p1  ;;  %p39_p5 = scmp.eq.s32.totalorder %s1112_s22, 0 }
   0x9   : > { %p146_p6 = scmp.eq.s32.totalorder %s1112_s22, 1  ;;  %p707_p9 = scmp.ge.s32.totalorder %s1026_s21, 2 }
   0xa   : > { %p1129_p7 = por %p39_p5, %p38_p3 }
   0xb   : > { %p1133_p8 = por %p146_p6, %p32_p1  ;;  %180 = sbr.rel (%p707_p9) target bundleno = 48 (0x30), region = 32 }
  0x10   : > { %183 = sbr.rel (!%p34_p4) target bundleno = 48 (0x30), region = 36  ;;  %s184_s29 = sand.u32 (%p34_p4), 1, %s1022_s20  }
  0x11   : > { %s709_s30 = sshll.u32 (%p34_p4), %s1026_s21, 1  ;;  %s708_s6 = sshll.u32 (%p34_p4), %s184_s29, 4 }
  0x12   : > { %s190_s7 = ssub.s32 (%p34_p4), 3, %s709_s30  ;;  %s1143_s10 = scalar_lea.sflag (%p34_p4), [#allocation3], %s184_s29 }
  0x13   : > { %p191_p10 = scmp.lt.s32.totalorder (%p34_p4), %s190_s7, 2  ;;  %s188_s11 = scalar_lea.vmem (%p34_p4), [#allocation2], %s708_s6 }
  0x15   : > { %s1351_s7 = smov (!%p191_p10, %s190_s7), 2 }
  0x16   : > { %s1140_s8 = sshll.u32 %s1351_s7, 7 }
  0x17   : > { %s195_s9 = ssub.s32 256, %s1140_s8 }
  0x18   : > { %196 = vsyncadd %s1143_s10, %s195_s9  ;;  %p711_p11 = scmp.ne.s32.totalorder %s1140_s8, 0  ;;  %s743_s12 = sshll.u32 %s1026_s21, 8 }
  0x19   : > { %s1151_s15 = scalar_lea.hbm %s1338_s0, %s743_s12  ;;  %s201_s16 = sshll.u32 %s188_s11, 4  ;;  %s1153_s16 = int_to_ptr.vmem [resolvable:$true] %s201_s16 }
  0x1a   : > { %s934_s17 = scalar_lea.hbm %s1151_s15, %s1140_s8  ;;  %s938_s25 = scalar_lea.hbm %s1338_s0, 384 }
  0x1b   : > { %p935_p12 = scmp.ne.s32.totalorder %s1151_s15, %s934_s17  ;;  %p939_p1 = scmp.lt.s32.totalorder %s1151_s15, %s1338_s0 }
  0x1c   : > { %p940_p2 = scmp.lt.s32.totalorder %s938_s25, %s934_s17 }
  0x1d   : > { %p936_p13 = pnand %p935_p12, %p711_p11 }
  0x1e   : > { %p941_p3 = por %p940_p2, %p939_p1 }
  0x1f   : > { %p937_p0 = pneg %p936_p13 }
  0x21   : > { %p942_p4 = pnand %p941_p3, %p937_p0 }
  0x23   : > { %945 = shalt.err (!%p942_p4)
}
  0x24   : > { %s946_s6 = scalar_lea.vmem %s1153_s16, %s1140_s8  ;;  %s1060_s7 = smov [#allocation2]  }
  0x25   : > { %p947_p5 = scmp.ne.s32.totalorder %s1153_s16, %s946_s6  ;;  %s950_s9 = sshll.u32 %s1060_s7, 4  ;;  %s951_s9 = int_to_ptr.vmem [resolvable:$false] %s950_s9 }
  0x26   : > { %s952_s11 = scalar_lea.vmem %s951_s9, 512  ;;  %p953_p10 = scmp.lt.s32.totalorder %s1153_s16, %s951_s9 }
  0x27   : > { %p948_p6 = pnand %p947_p5, %p711_p11  ;;  %p954_p12 = scmp.lt.s32.totalorder %s952_s11, %s946_s6 }
  0x29   : > { %p949_p9 = pneg %p948_p6  ;;  %p955_p13 = por %p954_p12, %p953_p10 }
  0x2b   : > { %p956_p1 = pnand %p955_p13, %p949_p9 }
  0x2d   : > { %959 = shalt.err (!%p956_p1)
}
  0x2e   : > { %s1061_s12 = smov 128   ;;  %s1062_s13 = smov 8  }
  0x2f   : > { %207 = dma.hbm_to_vmem [thread:$0]  (%p711_p11), %s1151_s15, %s1140_s8, %s1153_s16, %s1143_s10, %s1061_s12, %s1061_s12, %s1062_s13  }
  0x30 PF: > { %p715_p0 = scmp.ge.s32.totalorder %s1026_s21, 1  ;;  %p209_p2 = scmp.lt.s32.totalorder %s1026_s21, 3 }
  0x32   : > { %p210_p3 = pnand %p715_p0, %p209_p2 }
  0x33   : > { %s215_s14 = sand.u32 (!%p210_p3), 1, %s1018_s19  }
  0x34   : > { %213 = sbr.rel (%p210_p3) target bundleno = 524 (0x20c), region = 40  ;;  %s1182_s17 = sshll.u32 (!%p210_p3), %s215_s14, 4 }
  0x35   : > { %s216_s18 = scalar_lea.sflag (!%p210_p3), [#allocation3], %s215_s14  ;;  %s219_s24 = scalar_lea.vmem (!%p210_p3), [#allocation2], %s1182_s17 }
  0x39   : > { %1009 = dma.done.wait (%p1129_p7), %s216_s18, 256  }
  0x3a   : > { %1011 = vsyncadd (%p1129_p7), %s216_s18, 4294967040  ;;  %vm284_vm0 = vcmask 1043456   ;;  %v269_v0 = vld [vmem:[%s1339_s1 + $0x60] sm:$0xf]  ;;  %v268_v1 = vld [vmem:[%s1339_s1 + $0x58] sm:$0xff]  ;;  %vm277_vm1 = vcmask 818176  }
  0x3b   : > { %777 = vmatprep.subr.msk.mxu0 %vm284_vm0, %v269_v0  ;;  %v267_v2 = vld [vmem:[%s1339_s1 + $0x50] sm:$0xff]  ;;  %v266_v3 = vld [vmem:[%s1339_s1 + $0x48] sm:$0xff]  ;;  %v379_v5 = vld [vmem:[%s1341_s3 + $0x60] sm:$0xf]  ;;  %vm471_vm2 = vcmask 80896   ;;  %s1290_s16 = scalar_lea.vmem [#allocation4], %s1182_s17  }
  0x3c   : > { %778 = vmatpush3.msk.msra.mxu0 %vm284_vm0, %v269_v0  ;;  %v1205_v4 = vld [vmem:[%s219_s24] sm:$0xff]  ;;  %v378_v6 = vld [vmem:[%s1341_s3 + $0x58] sm:$0xff]  ;;  %806 = vmatprep.subr.msk.mxu1 %vm284_vm0, %v379_v5  ;;  %v376_v10 = vld [vmem:[%s1341_s3 + $0x48] sm:$0xff]  ;;  %s727_s25 = sshll.u32 (%p1133_p8), %s1112_s22, 1  ;;  %s744_s27 = sshll.u32 (%p1133_p8), %s1112_s22, 4 }
  0x3d   : > { %779 = vmatprep.subr.mxu0 %v268_v1  ;;  %803 = vmatprep.mubr.msk.f32.mxu0 %vm277_vm1, %v1205_v4  ;;  %v265_v7 = vld [vmem:[%s1339_s1 + $0x40] sm:$0xff]  ;;  %v377_v8 = vld [vmem:[%s1341_s3 + $0x50] sm:$0xff]  ;;  %v264_v9 = vld [vmem:[%s1339_s1 + $0x38] sm:$0xff]  ;;  %s482_s29 = ssub.s32 (%p1133_p8), 3, %s727_s25  ;;  %s1301_s7 = scalar_lea.vmem (%p1133_p8), %s1343_s5, %s744_s27  }
  0x3e   : > { %780 = vmatpush3.msra.mxu0 %v268_v1  ;;  %807 = vmatpush3.msk.msra.mxu1 %vm284_vm0, %v379_v5  ;;  %v263_v11 = vld [vmem:[%s1339_s1 + $0x30] sm:$0xff]  ;;  %v375_v12 = vld [vmem:[%s1341_s3 + $0x40] sm:$0xff]  ;;  %v262_v13 = vld [vmem:[%s1339_s1 + $0x28] sm:$0xff]  ;;  %p483_p7 = scmp.lt.s32.totalorder (%p1133_p8), %s482_s29, 2 }
  0x3f   : > { %781 = vmatprep.subr.mxu0 %v267_v2  ;;  %808 = vmatprep.subr.mxu1 %v378_v6  ;;  %v374_v14 = vld [vmem:[%s1341_s3 + $0x38] sm:$0xff]  ;;  %v261_v15 = vld [vmem:[%s1339_s1 + $0x20] sm:$0xff]  ;;  %v373_v16 = vld [vmem:[%s1341_s3 + $0x30] sm:$0xff] }
  0x40   : > { %782 = vmatpush3.msra.mxu0 %v267_v2  ;;  %809 = vmatpush3.msra.mxu1 %v378_v6  ;;  %v260_v17 = vld [vmem:[%s1339_s1 + $0x18] sm:$0xff]  ;;  %v372_v18 = vld [vmem:[%s1341_s3 + $0x28] sm:$0xff]  ;;  %v259_v19 = vld [vmem:[%s1339_s1 + $0x10] sm:$0xff] }
  0x41   : > { %783 = vmatprep.subr.mxu0 %v266_v3  ;;  %810 = vmatprep.subr.mxu1 %v377_v8  ;;  %v258_v20 = vld [vmem:[%s1339_s1 + $0x8] sm:$0xff]  ;;  %v257_v21 = vld [vmem:[%s1339_s1] sm:$0xff]  ;;  %v370_v24 = vld [vmem:[%s1341_s3 + $0x18] sm:$0xff] }
  0x42   : > { %784 = vmatpush3.msra.mxu0 %v266_v3  ;;  %811 = vmatpush3.msra.mxu1 %v377_v8  ;;  %v256_v22 = vld [vmem:[%s219_s24 + $0x8] sm:$0xff]  ;;  %v371_v23 = vld [vmem:[%s1341_s3 + $0x20] sm:$0xff]  ;;  %v369_v25 = vld [vmem:[%s1341_s3 + $0x10] sm:$0xff] }
  0x43   : > { %785 = vmatprep.subr.mxu0 %v265_v7  ;;  %812 = vmatprep.subr.mxu1 %v376_v10  ;;  %v368_v26 = vld [vmem:[%s1341_s3 + $0x8] sm:$0xff]  ;;  %v367_v27 = vld [vmem:[%s1341_s3] sm:$0xff] }
  0x44   : > { %786 = vmatpush3.msra.mxu0 %v265_v7  ;;  %813 = vmatpush3.msra.mxu1 %v376_v10  ;;  %v718_v28 = vld [vmem:[%s1340_s2] ss:$0 sm:$0xff] }
  0x45   : > { %787 = vmatprep.subr.mxu0 %v264_v9  ;;  %814 = vmatprep.subr.mxu1 %v375_v12  ;;  %v722_v37 = vld [vmem:[%s1342_s4] ss:$0 sm:$0xff] }
  0x46   : > { %788 = vmatpush3.msra.mxu0 %v264_v9  ;;  %815 = vmatpush3.msra.mxu1 %v375_v12 }
  0x47   : > { %789 = vmatprep.subr.mxu0 %v263_v11  ;;  %816 = vmatprep.subr.mxu1 %v374_v14 }
  0x48   : > { %790 = vmatpush3.msra.mxu0 %v263_v11  ;;  %817 = vmatpush3.msra.mxu1 %v374_v14 }
  0x49   : > { %791 = vmatprep.subr.mxu0 %v262_v13  ;;  %818 = vmatprep.subr.mxu1 %v373_v16 }
  0x4a   : > { %792 = vmatpush3.msra.mxu0 %v262_v13  ;;  %819 = vmatpush3.msra.mxu1 %v373_v16 }
  0x4b   : > { %793 = vmatprep.subr.mxu0 %v261_v15  ;;  %820 = vmatprep.subr.mxu1 %v372_v18 }
  0x4c   : > { %794 = vmatpush3.msra.mxu0 %v261_v15  ;;  %821 = vmatpush3.msra.mxu1 %v372_v18 }
  0x4d   : > { %795 = vmatprep.subr.mxu0 %v260_v17  ;;  %822 = vmatprep.subr.mxu1 %v371_v23 }
  0x4e   : > { %796 = vmatpush3.msra.mxu0 %v260_v17  ;;  %823 = vmatpush3.msra.mxu1 %v371_v23 }
  0x4f   : > { %797 = vmatprep.subr.mxu0 %v259_v19  ;;  %824 = vmatprep.subr.mxu1 %v370_v24 }
  0x50   : > { %798 = vmatpush3.msra.mxu0 %v259_v19  ;;  %825 = vmatpush3.msra.mxu1 %v370_v24 }
  0x51   : > { %799 = vmatprep.subr.mxu0 %v258_v20  ;;  %826 = vmatprep.subr.mxu1 %v369_v25 }
  0x52   : > { %800 = vmatpush3.msra.mxu0 %v258_v20  ;;  %827 = vmatpush3.msra.mxu1 %v369_v25 }
  0x53   : > { %801 = vmatprep.subr.mxu0 %v257_v21  ;;  %828 = vmatprep.subr.mxu1 %v368_v26 }
  0x54   : > { %802 = vmatpush3.msra.mxu0 %v257_v21  ;;  %829 = vmatpush3.msra.mxu1 %v368_v26 }
  0x55   : > { %804 = vmatmul.mubr.msk.f32.vlgmr.msra.gmra.mxu0 %vm277_vm1, %v256_v22  ;;  %830 = vmatprep.subr.mxu1 %v367_v27 }
  0x56   : > { %831 = vmatpush3.msra.mxu1 %v367_v27 }
 0x115   : > { %v805_v29 = vpop.f32.mrf.mxu0 }
 0x116   : > { %v360_v30 = vadd.f32 %v805_v29, %v718_v28 }
 0x117   : > { %v354_v31 = vpop.f32.mrf.mxu0 }
 0x118   : > { %v355_v32 = vadd.f32 %v718_v28, %v354_v31  ;;  %v364_v33 = vmax.f32 %v360_v30, 0.0 }
 0x11a   : > { %v363_v34 = vmax.f32 %v355_v32, 0.0  ;;  %v366_v36 = vadd.f32 %v364_v33, %v256_v22 }
 0x11c   : > { %v365_v35 = vadd.f32 %v363_v34, %v1205_v4 }
 0x11e   : > { %832 = vmatprep.mubr.msk.f32.mxu1 %vm277_vm1, %v365_v35 }
 0x11f   : > { %833 = vmatmul.mubr.msk.f32.vlgmr.msra.gmra.mxu1 %vm277_vm1, %v366_v36 }
 0x1df   : > { %v834_v38 = vpop.f32.mrf.mxu1 }
 0x1e0   : > { %v468_v39 = vadd.f32 %v834_v38, %v722_v37  ;;  %480 = sbr.rel (!%p1133_p8) target bundleno = 524 (0x20c), region = 48 }
 0x1e1   : > { %v462_v40 = vpop.f32.mrf.mxu1 }
 0x1e2   : > { %473 = vst.msk [vmem:[%s1290_s16 + $0x8] sm:$0xff] %vm471_vm2, %v468_v39  ;;  %v463_v41 = vadd.f32 %v722_v37, %v462_v40 }
 0x1e4   : > { %472 = vst.msk [vmem:[%s1290_s16] sm:$0xff] %vm471_vm2, %v463_v41 }
 0x1e5   : > { %s1353_s29 = smov (!%p483_p7, %s482_s29), 2 }
 0x1e6   : > { %s728_s17 = sshll.u32 %s1353_s29, 7 }
 0x1e7   : > { %p731_p11 = scmp.eq.s32.totalorder %s728_s17, 0 }
 0x1e8   : > { %s1307_s28 = sshrl.u32 (!%p731_p11), %s1353_s29, 1 }
 0x1e9   : > { %491 = sbr.rel (%p731_p11) target bundleno = 524 (0x20c), region = 52  ;;  %p732_p8 = scmp.le.s32.totalorder (!%p731_p11), %s1307_s28, 0 }
 0x1ee   : > { %658 = sbr.rel (%p732_p8) target bundleno = 507 (0x1fb), region = 134  ;;  %s1028_s22 = smov (!%p732_p8), %s1301_s7  }
 0x1ef   : > { %s1032_s9 = smov (!%p732_p8), %s1290_s16   ;;  %s1036_s11 = smov (!%p732_p8), 0  }
 0x1f0   : > { %s1040_s12 = smov (!%p732_p8), 0  }
 0x1f3 LB: >> { %v556_v42 = vld [vmem:[%s1034_s9] sm:$0xff]  ;;  %v558_v43 = vld [vmem:[%s1034_s9 + $0x8] sm:$0xff]  ;;  %s560_s24 = sadd.s32 1, %s1038_s11  ;;  %s550_s12 = sadd.s32 1, %s1042_s12   ;;  %s1042_s12 = sphi %s1040_s12, %s550_s12   ;;  %s1038_s11 = sphi %s1036_s11, %s1037_s11   ;;  %s1034_s9 = sphi %s1032_s9, %s565_s9   ;;  %s1030_s22 = sphi %s1028_s22, %s566_s22  }
 0x1f4   : >> { %557 = vst [vmem:[%s1030_s22] sm:$0xff] %v556_v42  ;;  %559 = vst [vmem:[%s1030_s22 + $0x8] sm:$0xff] %v558_v43  ;;  %p561_p4 = scmp.ge.s32.totalorder %s560_s24, %s1307_s28  ;;  %p549_p5 = scmp.ge.s32.totalorder %s550_s12, %s1307_s28 }
 0x1f6   : >> { %s1355_s24 = smov (%p561_p4, %s560_s24), 0  ;;  %552 = sbr.rel (!%p549_p5) target bundleno = 499 (0x1f3), region = 140 }
 0x1f7   : >> { %s733_s13 = sshll.u32 %s1355_s24, 4  ;;  %s1037_s11 = smov %s1355_s24  }
 0x1f8   : >> { %s565_s9 = scalar_lea.vmem %s1290_s16, %s733_s13 [#allocation4]   ;;  %s566_s22 = scalar_lea.vmem %s1301_s7, %s733_s13  }
 0x1fb PF: > { %s1317_s14 = sand.u32 1, %s1353_s29   ;;  %s745_s18 = sshll.u32 %s1307_s28, 4 }
 0x1fc   : > { %s571_s8 = scalar_lea.vmem %s1290_s16, %s745_s18 [#allocation4]   ;;  %s573_s10 = scalar_lea.vmem %s1301_s7, %s745_s18  }
 0x1fd   : > { %p738_p6 = scmp.le.s32.totalorder %s1317_s14, 0 }
 0x1fe   : > { %s1044_s21 = smov (!%p738_p6), %s573_s10   ;;  %s1048_s15 = smov (!%p738_p6), %s571_s8  }
 0x1ff   : > { %672 = sbr.rel (%p738_p6) target bundleno = 524 (0x20c), region = 145  ;;  %s1052_s25 = smov (!%p738_p6), 0  }
 0x200   : > { %s1056_s27 = smov (!%p738_p6), 0  }
 0x204 LB: >> { %v583_v44 = vld [vmem:[%s1050_s15] sm:$0xff]  ;;  %s585_s29 = sadd.s32 1, %s1054_s25  ;;  %s577_s27 = sadd.s32 1, %s1058_s27   ;;  %s1058_s27 = sphi %s1056_s27, %s577_s27   ;;  %s1054_s25 = sphi %s1052_s25, %s1053_s25   ;;  %s1050_s15 = sphi %s1048_s15, %s590_s15   ;;  %s1046_s21 = sphi %s1044_s21, %s591_s21  }
 0x205   : >> { %584 = vst [vmem:[%s1046_s21] sm:$0xff] %v583_v44  ;;  %p586_p9 = scmp.ge.s32.totalorder %s585_s29, %s1317_s14  ;;  %p576_p10 = scmp.ge.s32.totalorder %s577_s27, %s1317_s14 }
 0x207   : >> { %s1357_s29 = smov (%p586_p9, %s585_s29), 0  ;;  %579 = sbr.rel (!%p576_p10) target bundleno = 516 (0x204), region = 151 }
 0x208   : >> { %s739_s16 = sshll.u32 %s1357_s29, 3  ;;  %s1053_s25 = smov %s1357_s29  }
 0x209   : >> { %s590_s15 = scalar_lea.vmem %s571_s8, %s739_s16 [#allocation4]   ;;  %s591_s21 = scalar_lea.vmem %s573_s10, %s739_s16  }
 0x20c PF: > { %p15_p12 = scmp.ge.s32.totalorder %s1115_s23, 4   ;;  %s1346_s18 = smov %s1018_s19 }
 0x20d   : > { %s1347_s19 = smov %s1022_s20  ;;  %s1348_s20 = smov %s1125_s26 }
 0x20e   : > { %s1349_s21 = smov %s1115_s23  ;;  %17 = sbr.rel (!%p15_p12) target bundleno = 3 (0x3), region = 162 }
 0x213   :  { %607 = vsyncpa [#allocation3], 1 }
 0x214   :  { %609 = vsyncpa [#allocation3 + $0x1], 1 }

</bundles_post_ra>
